<compile_context>
chip_gen: v7x
topology: tpu7x:2x2x1
jax: 0.10.0
libtpu: 0.0.40
codegen_flags: <defaults>
</compile_context>

<pallas_src>
import jax
import jax.numpy as jnp
from jax import lax
from jax.experimental import pallas as pl
from jax.experimental.pallas import tpu as pltpu

ENCODER_VTH = 1.0


def _pop_spike_encoder_kernel(obs_ref, mean_ref, nhiv_ref, out_ref):
    """One batch block: compute pop_act once, run the whole spike_ts loop.

    obs_ref : (tb, Np)     f32  obs repeated pop_dim times (lane-padded)
    mean_ref: (1,  Np)     f32  flattened population means (lane-padded)
    nhiv_ref: (1,  Np)     f32  -0.5 / std^2 (precomputed in wrapper)
    out_ref : (T, tb, Np)  out dtype (bf16 default), time-major spike trains
    """
    diff = obs_ref[...] - mean_ref[...]
    act = jnp.exp(diff * diff * nhiv_ref[...])          # (tb, Np) f32, once per block

    def step(t, volt):
        volt = volt + act
        spike = volt > ENCODER_VTH
        out_ref[t] = spike.astype(out_ref.dtype)         # lane-dense store
        return volt - spike.astype(volt.dtype) * ENCODER_VTH

    # volt is a loop carry (vregs / compiler-managed VMEM), not VMEM scratch:
    # a single vector store per output vreg per step (v5e has one vst slot).
    lax.fori_loop(0, out_ref.shape[0], step, jnp.zeros_like(act), unroll=True)


def _pick_batch_tile(b_pad, n_pad, spike_ts, out_bytes,
                     vmem_budget_bytes=20 * 1024 * 1024):
    """Largest batch tile (multiple of 16, divides b_pad) that fits VMEM.

    Prefers >= 2 batch blocks so the 'parallel' grid axis can shard across
    both TensorCores on v7x.
    """
    def fits(tb):
        out_blk = 2 * spike_ts * tb * n_pad * out_bytes      # double-buffered output
        in_blk = 2 * tb * n_pad * 4 + 4 * n_pad * 4          # obs (x2) + mean + nhiv
        temps = 3 * tb * n_pad * 4                           # act / volt / spike temps
        return out_blk + in_blk + temps <= vmem_budget_bytes

    divisors = [d for d in range(16, b_pad + 1, 16) if b_pad % d == 0]
    multi = [d for d in divisors if b_pad // d >= 2 and fits(d)]
    if multi:
        return max(multi)
    single = [d for d in divisors if fits(d)]
    if single:
        return max(single)
    return 16  # smallest sensible tile; n_pad per row is fixed anyway


def pop_spike_encoder_forward(obs, mean, std, spike_ts, *,
                              out_dtype=jnp.bfloat16, time_major=True):
    """obs: (B, obs_dim) f32 -> spike trains.

    Returns (spike_ts, B, N) when time_major=True (preferred: no transpose,
    downstream PopSAN consumes per-timestep (B, N) slabs), or the PyTorch
    module's (B, N, spike_ts) layout when time_major=False. Values identical.
    Spikes are exactly 0/1, so bf16 output is lossless.
    """
    batch, obs_dim = obs.shape
    pop_dim = mean.shape[-1]
    neurons = obs_dim * pop_dim

    # Lane-dense / sublane-friendly padding.
    n_pad = max(128, int(pl.cdiv(neurons, 128)) * 128)
    b_pad = max(16, int(pl.cdiv(batch, 16)) * 16)

    # Layout plumbing in the wrapper (lane-dense (B, N) slabs for the kernel).
    obs_e = jnp.repeat(obs.astype(jnp.float32), pop_dim, axis=1)        # (B, N)
    mean_flat = mean.astype(jnp.float32).reshape(1, neurons)            # (1, N)
    nhiv = (-0.5 / (std.astype(jnp.float32) ** 2)).reshape(1, neurons)  # (1, N)
    # TODO(synk): std == 0 yields inf/NaN, same as the PyTorch reference.

    if n_pad != neurons:
        obs_e = jnp.pad(obs_e, ((0, 0), (0, n_pad - neurons)))
        mean_flat = jnp.pad(mean_flat, ((0, 0), (0, n_pad - neurons)))
        nhiv = jnp.pad(nhiv, ((0, 0), (0, n_pad - neurons)))
    if b_pad != batch:
        obs_e = jnp.pad(obs_e, ((0, b_pad - batch), (0, 0)))

    out_bytes = jnp.dtype(out_dtype).itemsize
    tb = _pick_batch_tile(b_pad, n_pad, spike_ts, out_bytes)
    n_b_blocks = b_pad // tb

    spikes = pl.pallas_call(
        _pop_spike_encoder_kernel,
        out_shape=jax.ShapeDtypeStruct((spike_ts, b_pad, n_pad), out_dtype),
        grid_spec=pltpu.PrefetchScalarGridSpec(
            num_scalar_prefetch=0,
            grid=(n_b_blocks,),
            in_specs=[
                pl.BlockSpec((tb, n_pad), lambda i: (i, 0)),
                pl.BlockSpec((1, n_pad), lambda i: (0, 0)),
                pl.BlockSpec((1, n_pad), lambda i: (0, 0)),
            ],
            # Time-major (T, B, N): neurons on the lane axis, whole T per step.
            out_specs=pl.BlockSpec((spike_ts, tb, n_pad), lambda i: (0, i, 0)),
        ),
        compiler_params=pltpu.CompilerParams(
            dimension_semantics=("parallel",),
            vmem_limit_bytes=32 * 1024 * 1024,
            allow_input_fusion=[True, False, False],
        ),
    )(obs_e, mean_flat, nhiv)

    # Strip padding (no-op when already aligned). Ideally downstream consumes
    # the padded (T, B_pad, N_pad) slab directly and this slice disappears.
    if b_pad != batch or n_pad != neurons:
        spikes = spikes[:, :batch, :neurons]

    if time_major:
        return spikes                                   # (T, B, N)
    return jnp.transpose(spikes, (1, 2, 0))             # (B, N, T) — PyTorch layout


def make_params(obs_dim, pop_dim, mean_range, std):
    """Parameter init mirroring PopSpikeEncoderAtan.__init__."""
    lo, hi = mean_range
    delta = (hi - lo) / (pop_dim - 1)
    mean = lo + delta * jnp.arange(pop_dim, dtype=jnp.float32)           # (pop,)
    mean = jnp.broadcast_to(mean[None, None, :], (1, obs_dim, pop_dim))
    std_arr = jnp.full((1, obs_dim, pop_dim), std, dtype=jnp.float32)
    return mean, std_arr


if __name__ == "__main__":
    batch = 2
    obs_dim = 4
    pop_dim = 8
    spike_ts = 8
    mean_range = (-3.0, 3.0)
    std = 0.5
    neurons = obs_dim * pop_dim

    key = jax.random.PRNGKey(0)
    obs = jax.random.normal(key, (batch, obs_dim), dtype=jnp.float32)
    mean, std_arr = make_params(obs_dim, pop_dim, mean_range, std)

    # Default fast path: time-major, bf16 spikes.
    out_tbn = pop_spike_encoder_forward(obs, mean, std_arr, spike_ts)
    out_tbn = jax.block_until_ready(out_tbn)

    # Strict PyTorch-layout / f32 path (compat only).
    out_bnt = pop_spike_encoder_forward(obs, mean, std_arr, spike_ts,
                                        out_dtype=jnp.float32,
                                        time_major=False)
    out_bnt = jax.block_until_ready(out_bnt)

    # Pure-JAX reference (same math / op order as the PyTorch forward).
    diff = obs[:, :, None] - mean
    pop_act = jnp.exp(diff * diff * (-0.5 / (std_arr * std_arr))).reshape(
        batch, neurons)
    volt = jnp.zeros((batch, neurons), dtype=jnp.float32)
    steps = []
    for _ in range(spike_ts):
        volt = volt + pop_act
        spike = (volt > ENCODER_VTH).astype(jnp.float32)
        steps.append(spike)
        volt = volt - spike * ENCODER_VTH
    ref_tbn = jnp.stack(steps, axis=0)    # (T, B, N)
    ref_bnt = jnp.stack(steps, axis=-1)   # (B, N, T)

    assert out_tbn.shape == (spike_ts, batch, neurons)
    assert out_bnt.shape == (batch, neurons, spike_ts)
    # Spikes are 0/1 -> any mismatch would show up as a full 1.0 difference.
    assert float(jnp.max(jnp.abs(out_tbn.astype(jnp.float32) - ref_tbn))) < 0.5
    assert float(jnp.max(jnp.abs(out_bnt - ref_bnt))) < 0.5

    print("KERNEL_OK")
</pallas_src>

<mosaic_0001>
module attributes {stable_mosaic.version = 11 : i64} {
  func.func @_pop_spike_encoder_kernel(%arg0: i32, %arg1: memref<16x128xf32, #tpu.memory_space<vmem>>, %arg2: memref<1x128xf32, #tpu.memory_space<vmem>>, %arg3: memref<1x128xf32, #tpu.memory_space<vmem>>, %arg4: memref<8x16x128xbf16, #tpu.memory_space<vmem>>) attributes {dimension_semantics = [#tpu.dimension_semantics<parallel>], iteration_bounds = array<i64: 1>, scalar_prefetch = 0 : i64, scratch_operands = 0 : i64, tpu.core_type = #tpu.core_type<tc>, window_params = [{transform_indices = @transform_0, window_bounds = array<i64: 16, 128>}, {pipeline_mode = #tpu.pipeline_mode<synchronous>, transform_indices = @transform_1, window_bounds = array<i64: 1, 128>}, {pipeline_mode = #tpu.pipeline_mode<synchronous>, transform_indices = @transform_2, window_bounds = array<i64: 1, 128>}, {transform_indices = @transform_3, window_bounds = array<i64: 8, 16, 128>}]} {
    %c0 = arith.constant 0 : index
    %c0_0 = arith.constant 0 : index
    %0 = vector.load %arg1[%c0, %c0_0] : memref<16x128xf32, #tpu.memory_space<vmem>>, vector<16x128xf32>
    %c0_1 = arith.constant 0 : index
    %c0_2 = arith.constant 0 : index
    %1 = vector.load %arg2[%c0_1, %c0_2] : memref<1x128xf32, #tpu.memory_space<vmem>>, vector<1x128xf32>
    %2 = vector.broadcast %1 : vector<1x128xf32> to vector<16x128xf32>
    %3 = arith.subf %0, %2 : vector<16x128xf32>
    %4 = arith.mulf %3, %3 : vector<16x128xf32>
    %c0_3 = arith.constant 0 : index
    %c0_4 = arith.constant 0 : index
    %5 = vector.load %arg3[%c0_3, %c0_4] : memref<1x128xf32, #tpu.memory_space<vmem>>, vector<1x128xf32>
    %6 = vector.broadcast %5 : vector<1x128xf32> to vector<16x128xf32>
    %7 = arith.mulf %4, %6 : vector<16x128xf32>
    %8 = math.exp %7 : vector<16x128xf32>
    %cst = arith.constant 0.000000e+00 : f32
    %9 = vector.broadcast %cst : f32 to vector<16x128xf32>
    %c0_i32 = arith.constant 0 : i32
    %10 = arith.addf %9, %8 : vector<16x128xf32>
    %cst_5 = arith.constant 1.000000e+00 : f32
    %11 = vector.broadcast %cst_5 : f32 to vector<16x128xf32>
    %12 = arith.cmpf ogt, %10, %11 : vector<16x128xf32>
    %13 = arith.extui %12 : vector<16x128xi1> to vector<16x128xi32>
    %14 = arith.sitofp %13 : vector<16x128xi32> to vector<16x128xf32>
    %15 = arith.truncf %14 : vector<16x128xf32> to vector<16x128xbf16>
    %16 = arith.index_cast %c0_i32 : i32 to index
    %c0_6 = arith.constant 0 : index
    %c0_7 = arith.constant 0 : index
    %17 = vector.load %arg4[%16, %c0_6, %c0_7] : memref<8x16x128xbf16, #tpu.memory_space<vmem>>, vector<1x16x128xbf16>
    %18 = vector.shape_cast %17 : vector<1x16x128xbf16> to vector<16x128xbf16>
    %19 = vector.shape_cast %15 : vector<16x128xbf16> to vector<1x16x128xbf16>
    tpu.vector_store %arg4[%16, %c0_6, %c0_7], %19 {strides = array<i32>} : memref<8x16x128xbf16, #tpu.memory_space<vmem>>, vector<1x16x128xbf16>,
    %20 = arith.extui %12 : vector<16x128xi1> to vector<16x128xi32>
    %21 = arith.sitofp %20 : vector<16x128xi32> to vector<16x128xf32>
    %cst_8 = arith.constant 1.000000e+00 : f32
    %22 = vector.broadcast %cst_8 : f32 to vector<16x128xf32>
    %23 = arith.mulf %21, %22 : vector<16x128xf32>
    %24 = arith.subf %10, %23 : vector<16x128xf32>
    %c1_i32 = arith.constant 1 : i32
    %25 = arith.addf %24, %8 : vector<16x128xf32>
    %cst_9 = arith.constant 1.000000e+00 : f32
    %26 = vector.broadcast %cst_9 : f32 to vector<16x128xf32>
    %27 = arith.cmpf ogt, %25, %26 : vector<16x128xf32>
    %28 = arith.extui %27 : vector<16x128xi1> to vector<16x128xi32>
    %29 = arith.sitofp %28 : vector<16x128xi32> to vector<16x128xf32>
    %30 = arith.truncf %29 : vector<16x128xf32> to vector<16x128xbf16>
    %31 = arith.index_cast %c1_i32 : i32 to index
    %c0_10 = arith.constant 0 : index
    %c0_11 = arith.constant 0 : index
    %32 = vector.load %arg4[%31, %c0_10, %c0_11] : memref<8x16x128xbf16, #tpu.memory_space<vmem>>, vector<1x16x128xbf16>
    %33 = vector.shape_cast %32 : vector<1x16x128xbf16> to vector<16x128xbf16>
    %34 = vector.shape_cast %30 : vector<16x128xbf16> to vector<1x16x128xbf16>
    tpu.vector_store %arg4[%31, %c0_10, %c0_11], %34 {strides = array<i32>} : memref<8x16x128xbf16, #tpu.memory_space<vmem>>, vector<1x16x128xbf16>,
    %35 = arith.extui %27 : vector<16x128xi1> to vector<16x128xi32>
    %36 = arith.sitofp %35 : vector<16x128xi32> to vector<16x128xf32>
    %cst_12 = arith.constant 1.000000e+00 : f32
    %37 = vector.broadcast %cst_12 : f32 to vector<16x128xf32>
    %38 = arith.mulf %36, %37 : vector<16x128xf32>
    %39 = arith.subf %25, %38 : vector<16x128xf32>
    %c2_i32 = arith.constant 2 : i32
    %40 = arith.addf %39, %8 : vector<16x128xf32>
    %cst_13 = arith.constant 1.000000e+00 : f32
    %41 = vector.broadcast %cst_13 : f32 to vector<16x128xf32>
    %42 = arith.cmpf ogt, %40, %41 : vector<16x128xf32>
    %43 = arith.extui %42 : vector<16x128xi1> to vector<16x128xi32>
    %44 = arith.sitofp %43 : vector<16x128xi32> to vector<16x128xf32>
    %45 = arith.truncf %44 : vector<16x128xf32> to vector<16x128xbf16>
    %46 = arith.index_cast %c2_i32 : i32 to index
    %c0_14 = arith.constant 0 : index
    %c0_15 = arith.constant 0 : index
    %47 = vector.load %arg4[%46, %c0_14, %c0_15] : memref<8x16x128xbf16, #tpu.memory_space<vmem>>, vector<1x16x128xbf16>
    %48 = vector.shape_cast %47 : vector<1x16x128xbf16> to vector<16x128xbf16>
    %49 = vector.shape_cast %45 : vector<16x128xbf16> to vector<1x16x128xbf16>
    tpu.vector_store %arg4[%46, %c0_14, %c0_15], %49 {strides = array<i32>} : memref<8x16x128xbf16, #tpu.memory_space<vmem>>, vector<1x16x128xbf16>,
    %50 = arith.extui %42 : vector<16x128xi1> to vector<16x128xi32>
    %51 = arith.sitofp %50 : vector<16x128xi32> to vector<16x128xf32>
    %cst_16 = arith.constant 1.000000e+00 : f32
    %52 = vector.broadcast %cst_16 : f32 to vector<16x128xf32>
    %53 = arith.mulf %51, %52 : vector<16x128xf32>
    %54 = arith.subf %40, %53 : vector<16x128xf32>
    %c3_i32 = arith.constant 3 : i32
    %55 = arith.addf %54, %8 : vector<16x128xf32>
    %cst_17 = arith.constant 1.000000e+00 : f32
    %56 = vector.broadcast %cst_17 : f32 to vector<16x128xf32>
    %57 = arith.cmpf ogt, %55, %56 : vector<16x128xf32>
    %58 = arith.extui %57 : vector<16x128xi1> to vector<16x128xi32>
    %59 = arith.sitofp %58 : vector<16x128xi32> to vector<16x128xf32>
    %60 = arith.truncf %59 : vector<16x128xf32> to vector<16x128xbf16>
    %61 = arith.index_cast %c3_i32 : i32 to index
    %c0_18 = arith.constant 0 : index
    %c0_19 = arith.constant 0 : index
    %62 = vector.load %arg4[%61, %c0_18, %c0_19] : memref<8x16x128xbf16, #tpu.memory_space<vmem>>, vector<1x16x128xbf16>
    %63 = vector.shape_cast %62 : vector<1x16x128xbf16> to vector<16x128xbf16>
    %64 = vector.shape_cast %60 : vector<16x128xbf16> to vector<1x16x128xbf16>
    tpu.vector_store %arg4[%61, %c0_18, %c0_19], %64 {strides = array<i32>} : memref<8x16x128xbf16, #tpu.memory_space<vmem>>, vector<1x16x128xbf16>,
    %65 = arith.extui %57 : vector<16x128xi1> to vector<16x128xi32>
    %66 = arith.sitofp %65 : vector<16x128xi32> to vector<16x128xf32>
    %cst_20 = arith.constant 1.000000e+00 : f32
    %67 = vector.broadcast %cst_20 : f32 to vector<16x128xf32>
    %68 = arith.mulf %66, %67 : vector<16x128xf32>
    %69 = arith.subf %55, %68 : vector<16x128xf32>
    %c4_i32 = arith.constant 4 : i32
    %70 = arith.addf %69, %8 : vector<16x128xf32>
    %cst_21 = arith.constant 1.000000e+00 : f32
    %71 = vector.broadcast %cst_21 : f32 to vector<16x128xf32>
    %72 = arith.cmpf ogt, %70, %71 : vector<16x128xf32>
    %73 = arith.extui %72 : vector<16x128xi1> to vector<16x128xi32>
    %74 = arith.sitofp %73 : vector<16x128xi32> to vector<16x128xf32>
    %75 = arith.truncf %74 : vector<16x128xf32> to vector<16x128xbf16>
    %76 = arith.index_cast %c4_i32 : i32 to index
    %c0_22 = arith.constant 0 : index
    %c0_23 = arith.constant 0 : index
    %77 = vector.load %arg4[%76, %c0_22, %c0_23] : memref<8x16x128xbf16, #tpu.memory_space<vmem>>, vector<1x16x128xbf16>
    %78 = vector.shape_cast %77 : vector<1x16x128xbf16> to vector<16x128xbf16>
    %79 = vector.shape_cast %75 : vector<16x128xbf16> to vector<1x16x128xbf16>
    tpu.vector_store %arg4[%76, %c0_22, %c0_23], %79 {strides = array<i32>} : memref<8x16x128xbf16, #tpu.memory_space<vmem>>, vector<1x16x128xbf16>,
    %80 = arith.extui %72 : vector<16x128xi1> to vector<16x128xi32>
    %81 = arith.sitofp %80 : vector<16x128xi32> to vector<16x128xf32>
    %cst_24 = arith.constant 1.000000e+00 : f32
    %82 = vector.broadcast %cst_24 : f32 to vector<16x128xf32>
    %83 = arith.mulf %81, %82 : vector<16x128xf32>
    %84 = arith.subf %70, %83 : vector<16x128xf32>
    %c5_i32 = arith.constant 5 : i32
    %85 = arith.addf %84, %8 : vector<16x128xf32>
    %cst_25 = arith.constant 1.000000e+00 : f32
    %86 = vector.broadcast %cst_25 : f32 to vector<16x128xf32>
    %87 = arith.cmpf ogt, %85, %86 : vector<16x128xf32>
    %88 = arith.extui %87 : vector<16x128xi1> to vector<16x128xi32>
    %89 = arith.sitofp %88 : vector<16x128xi32> to vector<16x128xf32>
    %90 = arith.truncf %89 : vector<16x128xf32> to vector<16x128xbf16>
    %91 = arith.index_cast %c5_i32 : i32 to index
    %c0_26 = arith.constant 0 : index
    %c0_27 = arith.constant 0 : index
    %92 = vector.load %arg4[%91, %c0_26, %c0_27] : memref<8x16x128xbf16, #tpu.memory_space<vmem>>, vector<1x16x128xbf16>
    %93 = vector.shape_cast %92 : vector<1x16x128xbf16> to vector<16x128xbf16>
    %94 = vector.shape_cast %90 : vector<16x128xbf16> to vector<1x16x128xbf16>
    tpu.vector_store %arg4[%91, %c0_26, %c0_27], %94 {strides = array<i32>} : memref<8x16x128xbf16, #tpu.memory_space<vmem>>, vector<1x16x128xbf16>,
    %95 = arith.extui %87 : vector<16x128xi1> to vector<16x128xi32>
    %96 = arith.sitofp %95 : vector<16x128xi32> to vector<16x128xf32>
    %cst_28 = arith.constant 1.000000e+00 : f32
    %97 = vector.broadcast %cst_28 : f32 to vector<16x128xf32>
    %98 = arith.mulf %96, %97 : vector<16x128xf32>
    %99 = arith.subf %85, %98 : vector<16x128xf32>
    %c6_i32 = arith.constant 6 : i32
    %100 = arith.addf %99, %8 : vector<16x128xf32>
    %cst_29 = arith.constant 1.000000e+00 : f32
    %101 = vector.broadcast %cst_29 : f32 to vector<16x128xf32>
    %102 = arith.cmpf ogt, %100, %101 : vector<16x128xf32>
    %103 = arith.extui %102 : vector<16x128xi1> to vector<16x128xi32>
    %104 = arith.sitofp %103 : vector<16x128xi32> to vector<16x128xf32>
    %105 = arith.truncf %104 : vector<16x128xf32> to vector<16x128xbf16>
    %106 = arith.index_cast %c6_i32 : i32 to index
    %c0_30 = arith.constant 0 : index
    %c0_31 = arith.constant 0 : index
    %107 = vector.load %arg4[%106, %c0_30, %c0_31] : memref<8x16x128xbf16, #tpu.memory_space<vmem>>, vector<1x16x128xbf16>
    %108 = vector.shape_cast %107 : vector<1x16x128xbf16> to vector<16x128xbf16>
    %109 = vector.shape_cast %105 : vector<16x128xbf16> to vector<1x16x128xbf16>
    tpu.vector_store %arg4[%106, %c0_30, %c0_31], %109 {strides = array<i32>} : memref<8x16x128xbf16, #tpu.memory_space<vmem>>, vector<1x16x128xbf16>,
    %110 = arith.extui %102 : vector<16x128xi1> to vector<16x128xi32>
    %111 = arith.sitofp %110 : vector<16x128xi32> to vector<16x128xf32>
    %cst_32 = arith.constant 1.000000e+00 : f32
    %112 = vector.broadcast %cst_32 : f32 to vector<16x128xf32>
    %113 = arith.mulf %111, %112 : vector<16x128xf32>
    %114 = arith.subf %100, %113 : vector<16x128xf32>
    %c7_i32 = arith.constant 7 : i32
    %115 = arith.addf %114, %8 : vector<16x128xf32>
    %cst_33 = arith.constant 1.000000e+00 : f32
    %116 = vector.broadcast %cst_33 : f32 to vector<16x128xf32>
    %117 = arith.cmpf ogt, %115, %116 : vector<16x128xf32>
    %118 = arith.extui %117 : vector<16x128xi1> to vector<16x128xi32>
    %119 = arith.sitofp %118 : vector<16x128xi32> to vector<16x128xf32>
    %120 = arith.truncf %119 : vector<16x128xf32> to vector<16x128xbf16>
    %121 = arith.index_cast %c7_i32 : i32 to index
    %c0_34 = arith.constant 0 : index
    %c0_35 = arith.constant 0 : index
    %122 = vector.load %arg4[%121, %c0_34, %c0_35] : memref<8x16x128xbf16, #tpu.memory_space<vmem>>, vector<1x16x128xbf16>
    %123 = vector.shape_cast %122 : vector<1x16x128xbf16> to vector<16x128xbf16>
    %124 = vector.shape_cast %120 : vector<16x128xbf16> to vector<1x16x128xbf16>
    tpu.vector_store %arg4[%121, %c0_34, %c0_35], %124 {strides = array<i32>} : memref<8x16x128xbf16, #tpu.memory_space<vmem>>, vector<1x16x128xbf16>,
    %125 = arith.extui %117 : vector<16x128xi1> to vector<16x128xi32>
    %126 = arith.sitofp %125 : vector<16x128xi32> to vector<16x128xf32>
    %cst_36 = arith.constant 1.000000e+00 : f32
    %127 = vector.broadcast %cst_36 : f32 to vector<16x128xf32>
    %128 = arith.mulf %126, %127 : vector<16x128xf32>
    %129 = arith.subf %115, %128 : vector<16x128xf32>
    %c8_i32 = arith.constant 8 : i32
    return
  }
  func.func @transform_0(%arg0: i32) -> (i32, i32) {
    %c0_i32 = arith.constant 0 : i32
    %c0_i32_0 = arith.constant 0 : i32
    return %arg0, %c0_i32 : i32, i32
  }
  func.func @transform_1(%arg0: i32) -> (i32, i32) {
    %c0_i32 = arith.constant 0 : i32
    %c0_i32_0 = arith.constant 0 : i32
    %c0_i32_1 = arith.constant 0 : i32
    return %c0_i32, %c0_i32_0 : i32, i32
  }
  func.func @transform_2(%arg0: i32) -> (i32, i32) {
    %c0_i32 = arith.constant 0 : i32
    %c0_i32_0 = arith.constant 0 : i32
    %c0_i32_1 = arith.constant 0 : i32
    return %c0_i32, %c0_i32_0 : i32, i32
  }
  func.func @transform_3(%arg0: i32) -> (i32, i32, i32) {
    %c0_i32 = arith.constant 0 : i32
    %c0_i32_0 = arith.constant 0 : i32
    %c0_i32_1 = arith.constant 0 : i32
    return %c0_i32, %arg0, %c0_i32_0 : i32, i32, i32
  }
}

</mosaic_0001>

<bundles_post_ra>
// kernel: tpu_custom_call.1
= control target key start
LH: loop header
LB: loop body
LE: loop exit
PB: predicated region body
PF: predicated region fallthrough
CT: control target
= control target key end

     0   :  { %8 = vsyncpa [#allocation3], 0  ;;  %s465_s0 = inlined_call_operand.hbm [shape: f32[16,128], index: 0, kind: input, shape index: {}]   ;;  %s466_s1 = inlined_call_operand.vmem [shape: f32[1,128], index: 1, kind: input, shape index: {}]   ;;  %s467_s2 = inlined_call_operand.vmem [shape: f32[1,128], index: 2, kind: input, shape index: {}]   ;;  %s468_s3 = inlined_call_operand.hbm [shape: bf16[8,16,128], index: 3, kind: output, shape index: {}]  }
   0x1   :  { %9 = vsyncpa [#allocation4], 0  ;;  %s370_s12 = smov [#allocation2]   ;;  %s322_s16 = scalar_lea.hbm %s465_s0, 256 }
   0x2   :  { %s15_s13 = sshll.u32 %s370_s12, 4  ;;  %p323_p0 = scmp.ne.s32.totalorder %s465_s0, %s322_s16  ;;  %s16_s13 = int_to_ptr.vmem [resolvable:$true] %s15_s13 }
   0x3   :  { %p326_p1 = scmp.lt.u32.totalorder %s322_s16, %s465_s0 }
   0x5   :  { %p328_p2 = pnand %p326_p1, %p323_p0 }
   0x7   :  { %331 = shalt.err (!%p328_p2)
}
   0x8   :  { %s332_s21 = scalar_lea.vmem %s16_s13, 256  ;;  %p337_p4 = scmp.lt.s32.totalorder %s16_s13, %s16_s13 }
   0x9   :  { %p333_p3 = scmp.ne.s32.totalorder %s16_s13, %s332_s21  ;;  %p338_p5 = scmp.lt.s32.totalorder %s332_s21, %s332_s21 }
   0xb   :  { %p339_p6 = por %p338_p5, %p337_p4 }
   0xd   :  { %p340_p7 = pnand %p339_p6, %p333_p3 }
   0xf   :  { %343 = shalt.err (!%p340_p7)
}
  0x10   :  { %s371_s22 = smov 128   ;;  %s372_s23 = smov 8  }
  0x11   :  { %21 = dma.hbm_to_vmem [thread:$0]  %s465_s0, 256, %s16_s13, [#allocation3], %s371_s22, %s371_s22, %s372_s23  }
  0x12   :  { %366 = dma.done.wait [#allocation3], 256  }
  0x13   :  { %367 = vsyncadd [#allocation3], 4294967040  ;;  %v29_v0 = vld [vmem:[#allocation2] sm:$0xff]  ;;  %v30_v1 = vld [vmem:[#allocation2 + $0x8] sm:$0xff]  ;;  %v373_v14 = vmov 0.0   ;;  %s374_s0 = smov [#allocation5]  }
  0x14   :  { %v237_v2 = vld [vmem:[%s466_s1] ss:$0 sm:$0xff]  ;;  %s225_s1 = sshll.u32 %s374_s0, 4  ;;  %s226_s1 = int_to_ptr.vmem [resolvable:$true] %s225_s1 }
  0x15   :  { %v38_v3 = vsub.f32 %v29_v0, %v237_v2  ;;  %v39_v4 = vsub.f32 %v30_v1, %v237_v2  ;;  %v238_v5 = vld [vmem:[%s467_s2] ss:$0 sm:$0xff]  ;;  %s344_s2 = scalar_lea.vmem %s226_s1, 1024  ;;  %p349_p9 = scmp.lt.s32.totalorder %s226_s1, %s226_s1 }
  0x16   :  { %p345_p8 = scmp.ne.s32.totalorder %s226_s1, %s344_s2  ;;  %p350_p10 = scmp.lt.s32.totalorder %s344_s2, %s344_s2 }
  0x17   :  { %v40_v6 = vmul.f32 %v38_v3, %v38_v3  ;;  %v41_v7 = vmul.f32 %v39_v4, %v39_v4 }
  0x18   :  { %p351_p11 = por %p350_p10, %p349_p9 }
  0x19   :  { %v49_v8 = vmul.f32 %v238_v5, %v40_v6  ;;  %v50_v9 = vmul.f32 %v238_v5, %v41_v7 }
  0x1a   :  { %p352_p12 = pnand %p351_p11, %p345_p8 }
  0x1b   :  { %v51_v10 = vmul.f32 1.442695, %v49_v8  ;;  %v53_v11 = vmul.f32 1.442695, %v50_v9 }
  0x1d   :  { %318 = vpow2.f32 %v51_v10 }
  0x1e   :  { %320 = vpow2.f32 %v53_v11 }
  0x27   :  { %v415_v12 = vpop.eup %318 }
  0x28   :  { %v417_v13 = vpop.eup %320  ;;  %vm57_vm0 = vcmp.gt.f32.partialorder %v415_v12, 1.0 }
  0x29   :  { %vm58_vm1 = vcmp.gt.f32.partialorder %v417_v13, 1.0  ;;  %v239_v15 = vsel %vm57_vm0, 1.0, %v373_v14 }
  0x2a   :  { %v240_v16 = vsel %vm58_vm1, 1.0, %v373_v14  ;;  %v73_v17 = vsub.f32 %v415_v12, %v239_v15 }
  0x2b   :  { %v288_v18 = vpack.c.bf16 %v240_v16, %v239_v15  ;;  %v74_v19 = vsub.f32 %v417_v13, %v240_v16 }
  0x2c   :  { %v75_v20 = vadd.f32 %v415_v12, %v73_v17 }
  0x2d   :  { %289 = vst [vmem:[#allocation5] sm:$0xff] %v288_v18   ;;  %v76_v21 = vadd.f32 %v417_v13, %v74_v19 }
  0x2e   :  { %vm77_vm2 = vcmp.gt.f32.partialorder %v75_v20, 1.0 }
  0x2f   :  { %vm78_vm3 = vcmp.gt.f32.partialorder %v76_v21, 1.0  ;;  %v243_v22 = vsel %vm77_vm2, 1.0, %v373_v14 }
  0x30   :  { %v244_v23 = vsel %vm78_vm3, 1.0, %v373_v14  ;;  %v94_v24 = vsub.f32 %v75_v20, %v243_v22 }
  0x31   :  { %v291_v25 = vpack.c.bf16 %v244_v23, %v243_v22  ;;  %v95_v26 = vsub.f32 %v76_v21, %v244_v23 }
  0x32   :  { %v96_v27 = vadd.f32 %v415_v12, %v94_v24 }
  0x33   :  { %292 = vst [vmem:[#allocation5 + $0x8] sm:$0xff] %v291_v25   ;;  %v97_v28 = vadd.f32 %v417_v13, %v95_v26 }
  0x34   :  { %vm98_vm4 = vcmp.gt.f32.partialorder %v96_v27, 1.0 }
  0x35   :  { %vm99_vm5 = vcmp.gt.f32.partialorder %v97_v28, 1.0  ;;  %v247_v29 = vsel %vm98_vm4, 1.0, %v373_v14 }
  0x36   :  { %v248_v30 = vsel %vm99_vm5, 1.0, %v373_v14  ;;  %v115_v31 = vsub.f32 %v96_v27, %v247_v29 }
  0x37   :  { %v294_v32 = vpack.c.bf16 %v248_v30, %v247_v29  ;;  %v116_v33 = vsub.f32 %v97_v28, %v248_v30 }
  0x38   :  { %v117_v34 = vadd.f32 %v415_v12, %v115_v31 }
  0x39   :  { %295 = vst [vmem:[#allocation5 + $0x10] sm:$0xff] %v294_v32   ;;  %v118_v35 = vadd.f32 %v417_v13, %v116_v33 }
  0x3a   :  { %vm119_vm6 = vcmp.gt.f32.partialorder %v117_v34, 1.0 }
  0x3b   :  { %vm120_vm7 = vcmp.gt.f32.partialorder %v118_v35, 1.0  ;;  %v251_v36 = vsel %vm119_vm6, 1.0, %v373_v14 }
  0x3c   :  { %v252_v37 = vsel %vm120_vm7, 1.0, %v373_v14  ;;  %v136_v38 = vsub.f32 %v117_v34, %v251_v36 }
  0x3d   :  { %v297_v39 = vpack.c.bf16 %v252_v37, %v251_v36  ;;  %v137_v40 = vsub.f32 %v118_v35, %v252_v37 }
  0x3e   :  { %v138_v41 = vadd.f32 %v415_v12, %v136_v38 }
  0x3f   :  { %298 = vst [vmem:[#allocation5 + $0x18] sm:$0xff] %v297_v39   ;;  %v139_v42 = vadd.f32 %v417_v13, %v137_v40 }
  0x40   :  { %vm140_vm8 = vcmp.gt.f32.partialorder %v138_v41, 1.0 }
  0x41   :  { %vm141_vm9 = vcmp.gt.f32.partialorder %v139_v42, 1.0  ;;  %v255_v43 = vsel %vm140_vm8, 1.0, %v373_v14 }
  0x42   :  { %v256_v44 = vsel %vm141_vm9, 1.0, %v373_v14  ;;  %v157_v45 = vsub.f32 %v138_v41, %v255_v43 }
  0x43   :  { %v300_v46 = vpack.c.bf16 %v256_v44, %v255_v43  ;;  %v158_v47 = vsub.f32 %v139_v42, %v256_v44 }
  0x44   :  { %v159_v48 = vadd.f32 %v415_v12, %v157_v45 }
  0x45   :  { %301 = vst [vmem:[#allocation5 + $0x20] sm:$0xff] %v300_v46   ;;  %v160_v49 = vadd.f32 %v417_v13, %v158_v47 }
  0x46   :  { %vm161_vm10 = vcmp.gt.f32.partialorder %v159_v48, 1.0 }
  0x47   :  { %vm162_vm11 = vcmp.gt.f32.partialorder %v160_v49, 1.0  ;;  %v259_v50 = vsel %vm161_vm10, 1.0, %v373_v14 }
  0x48   :  { %v260_v51 = vsel %vm162_vm11, 1.0, %v373_v14  ;;  %v178_v52 = vsub.f32 %v159_v48, %v259_v50 }
  0x49   :  { %v303_v53 = vpack.c.bf16 %v260_v51, %v259_v50  ;;  %v179_v54 = vsub.f32 %v160_v49, %v260_v51 }
  0x4a   :  { %v180_v55 = vadd.f32 %v415_v12, %v178_v52 }
  0x4b   :  { %304 = vst [vmem:[#allocation5 + $0x28] sm:$0xff] %v303_v53   ;;  %v181_v56 = vadd.f32 %v417_v13, %v179_v54 }
  0x4c   :  { %vm182_vm12 = vcmp.gt.f32.partialorder %v180_v55, 1.0 }
  0x4d   :  { %vm183_vm13 = vcmp.gt.f32.partialorder %v181_v56, 1.0  ;;  %v263_v57 = vsel %vm182_vm12, 1.0, %v373_v14 }
  0x4e   :  { %v264_v58 = vsel %vm183_vm13, 1.0, %v373_v14  ;;  %v199_v59 = vsub.f32 %v180_v55, %v263_v57 }
  0x4f   :  { %v306_v60 = vpack.c.bf16 %v264_v58, %v263_v57  ;;  %v200_v61 = vsub.f32 %v181_v56, %v264_v58 }
  0x50   :  { %v201_v62 = vadd.f32 %v415_v12, %v199_v59 }
  0x51   :  { %307 = vst [vmem:[#allocation5 + $0x30] sm:$0xff] %v306_v60   ;;  %v202_v63 = vadd.f32 %v417_v13, %v200_v61 }
  0x52   :  { %vm203_vm14 = vcmp.gt.f32.partialorder %v201_v62, 1.0 }
  0x53   :  { %vm204_vm15 = vcmp.gt.f32.partialorder %v202_v63, 1.0  ;;  %v267_v0 = vsel %vm203_vm14, 1.0, %v373_v14 }
  0x54   :  { %v268_v1 = vsel %vm204_vm15, 1.0, %v373_v14 }
  0x55   :  { %v309_v2 = vpack.c.bf16 %v268_v1, %v267_v0 }
  0x57   :  { %310 = vst [vmem:[#allocation5 + $0x38] sm:$0xff] %v309_v2  }
  0x58   :  { %355 = shalt.err (!%p352_p12)
}
  0x59   :  { %s356_s5 = scalar_lea.hbm %s468_s3, 1024 }
  0x5a   :  { %p357_p13 = scmp.ne.s32.totalorder %s468_s3, %s356_s5  ;;  %p360_p0 = scmp.lt.u32.totalorder %s356_s5, %s468_s3 }
  0x5c   :  { %p362_p1 = pnand %p360_p0, %p357_p13 }
  0x5e   :  { %365 = shalt.err (!%p362_p1)
}
  0x5f   :  { %s375_s10 = smov 64   ;;  %s376_s11 = smov 4  }
  0x60   :  { %231 = dma.vmem_to_hbm [thread:$0]  %s226_s1, 1024, %s468_s3, [#allocation4], %s375_s10, %s375_s10, %s376_s11  }
  0x61   :  { %368 = dma.done.wait [#allocation4], 1024  }
  0x62   :  { %369 = vsyncadd [#allocation4], 4294966272 }
  0x63   :  { %235 = vsyncpa [#allocation3], 1 }
  0x64   :  { %236 = vsyncpa [#allocation4], 1 }

</bundles_post_ra>
